<compile_context>
chip_gen: v5e
topology: v5e:2x2
jax: 0.10.0
libtpu: 0.0.40
codegen_flags: <defaults>
</compile_context>

<pallas_src>
import jax
import jax.numpy as jnp
from jax.experimental import pallas as pl
from jax.experimental.pallas import tpu as pltpu


def lstm_last_kernel(x_ref, w_ref, b_ref, out_ref):
    """Full single-layer LSTM recurrence in one kernel invocation.

    x_ref:   (seq_len * B, input_size)  f32   time-major, batch padded to B
    w_ref:   (input_size + hidden, 4H)  bf16  rows [0:I) = W_ih^T, [I:) = W_hh^T
    b_ref:   (1, 4H)                    f32   b_ih + b_hh
    out_ref: (B, hidden)                f32   h_T  (== PyTorch outputs[-1])
    """
    B = out_ref.shape[0]            # padded batch (= 8, one sublane group)
    H = out_ref.shape[1]            # hidden size
    I = x_ref.shape[1]              # input size
    seq_len = x_ref.shape[0] // B
    H4 = 4 * H

    # x cast done in-kernel (one-time VPU pass, not on the serial chain).
    x_bf = x_ref[...].astype(jnp.bfloat16)

    w = w_ref[...]                  # (I+H, 4H) bf16, resident in vregs
    w_ih = w[:I, :]                 # (I, 4H)  -- 16-row slice, bf16-tile aligned
    w_hh = w[I:, :]                 # (H, 4H)

    # ---- Hoisted input projection for ALL time steps: one MXU pass ----
    # xproj[t*B:(t+1)*B] = x_t @ W_ih^T + (b_ih + b_hh), f32 accumulate.
    xproj = jnp.dot(x_bf, w_ih, preferred_element_type=jnp.float32) + b_ref[...]

    # ---- One-tanh activation (single EUP pass per step) -----------------
    # PyTorch gate order along 4H is [i, f, g, o].  For i/f/o lanes we want
    # sigmoid(z) = 0.5*tanh(z/2) + 0.5; for g lanes we want tanh(z).
    # Per-lane constants are hoisted out of the time loop.
    lane = jax.lax.broadcasted_iota(jnp.int32, (B, H4), 1)
    is_g = jnp.logical_and(lane >= 2 * H, lane < 3 * H)
    pre_scale = jnp.where(is_g, 1.0, 0.5).astype(jnp.float32)   # z -> z or z/2
    post_mul = pre_scale                                        # t -> t or t/2
    post_add = jnp.where(is_g, 0.0, 0.5).astype(jnp.float32)    #   (+0 or +0.5)

    def activate(gates):
        t = jnp.tanh(gates * pre_scale)      # single full-width EUP pass
        return t * post_mul + post_add       # cheap full-width VPU affine

    # ---- Peeled t = 0: h = c = 0, skip the recurrent matmul and f*c ----
    act = activate(xproj[0:B, :])
    i_g = act[:, 0 * H:1 * H]
    g_g = act[:, 2 * H:3 * H]
    o_g = act[:, 3 * H:4 * H]
    c = i_g * g_g
    h = o_g * jnp.tanh(c)

    # ---- Remaining steps: serial (B,H)@(H,4H) MXU pass + VPU/EUP -------
    # seq_len is a small trace-time constant -> statically unrolled.
    for t in range(1, seq_len):
        gates = xproj[t * B:(t + 1) * B, :] + jnp.dot(
            h.astype(jnp.bfloat16), w_hh, preferred_element_type=jnp.float32)
        act = activate(gates)
        i_g = act[:, 0 * H:1 * H]
        f_g = act[:, 1 * H:2 * H]
        g_g = act[:, 2 * H:3 * H]
        o_g = act[:, 3 * H:4 * H]
        c = f_g * c + i_g * g_g
        h = o_g * jnp.tanh(c)

    out_ref[...] = h.astype(out_ref.dtype)


def prepare_lstm_params(w_ih, w_hh, b_ih, b_hh):
    """One-time parameter prep (do NOT re-run per forward call).

    Transposes the PyTorch weights, casts to bf16, packs W_ih^T and W_hh^T
    into a single (I+H, 4H) buffer, and folds the two biases (kept f32).
    """
    w_ih_t = jnp.asarray(w_ih, jnp.float32).T.astype(jnp.bfloat16)   # (I, 4H)
    w_hh_t = jnp.asarray(w_hh, jnp.float32).T.astype(jnp.bfloat16)   # (H, 4H)
    w_packed = jnp.concatenate([w_ih_t, w_hh_t], axis=0)             # (I+H, 4H)
    b = (jnp.asarray(b_ih, jnp.float32)
         + jnp.asarray(b_hh, jnp.float32)).reshape(1, -1)            # (1, 4H)
    return w_packed, b


def neural_network_forward(x, w_packed, b):
    """Pallas equivalent of NeuralNetwork.forward (LSTM -> outputs[-1]).

    x:        (seq_len, batch, input_size)  (batch_first=False)
    w_packed: (input_size + hidden, 4*hidden) bf16   from prepare_lstm_params
    b:        (1, 4*hidden) f32                      from prepare_lstm_params
    returns:  (batch, hidden) float32  == h_T
    """
    seq_len, batch, input_size = x.shape
    hidden = b.shape[1] // 4

    # Pad batch up to one sublane group (8) so all vreg ops are unmasked;
    # padded rows are sliced off again below.
    B_PAD = 8
    pad = (-batch) % B_PAD
    if pad:
        x = jnp.pad(x, ((0, 0), (0, pad), (0, 0)))
    bp = batch + pad

    x_flat = x.astype(jnp.float32).reshape(seq_len * bp, input_size)

    out = pl.pallas_call(
        lstm_last_kernel,
        out_shape=jax.ShapeDtypeStruct((bp, hidden), jnp.float32),
        in_specs=[
            pl.BlockSpec(memory_space=pltpu.MemorySpace.VMEM),  # x (all steps)
            pl.BlockSpec(memory_space=pltpu.MemorySpace.VMEM),  # packed weights
            pl.BlockSpec(memory_space=pltpu.MemorySpace.VMEM),  # folded bias
        ],
        out_specs=pl.BlockSpec(memory_space=pltpu.MemorySpace.VMEM),
    )(x_flat, w_packed, b)

    return out[:batch]   # float32, matching PyTorch's LSTM output dtype


def neural_network_forward_ref(x, w_ih, w_hh, b_ih, b_hh):
    """Pure-JAX f32 reference of the PyTorch LSTM forward + outputs[-1]."""
    seq_len, batch, _ = x.shape
    hidden = w_hh.shape[1]
    h = jnp.zeros((batch, hidden), jnp.float32)
    c = jnp.zeros((batch, hidden), jnp.float32)
    for t in range(seq_len):
        gates = x[t] @ w_ih.T + h @ w_hh.T + b_ih + b_hh
        i_g, f_g, g_g, o_g = jnp.split(gates, 4, axis=-1)
        i_g = jax.nn.sigmoid(i_g)
        f_g = jax.nn.sigmoid(f_g)
        g_g = jnp.tanh(g_g)
        o_g = jax.nn.sigmoid(o_g)
        c = f_g * c + i_g * g_g
        h = o_g * jnp.tanh(c)
    return h


if __name__ == "__main__":
    # Shapes implied by the module: NeuralNetwork("LSTM", input_size=16,
    # hidden_size=32, batch_first=False); x: (seq=8, batch=2, input=16).
    seq_len, batch, input_size, hidden = 8, 2, 16, 32

    key = jax.random.PRNGKey(0)
    kx, k1, k2, k3, k4 = jax.random.split(key, 5)

    # Deterministic parameter init mirroring PyTorch's U(-1/sqrt(H), 1/sqrt(H)).
    scale = 1.0 / jnp.sqrt(jnp.float32(hidden))
    w_ih = jax.random.uniform(k1, (4 * hidden, input_size), jnp.float32,
                              -scale, scale)
    w_hh = jax.random.uniform(k2, (4 * hidden, hidden), jnp.float32,
                              -scale, scale)
    b_ih = jax.random.uniform(k3, (4 * hidden,), jnp.float32, -scale, scale)
    b_hh = jax.random.uniform(k4, (4 * hidden,), jnp.float32, -scale, scale)

    x = jax.random.normal(kx, (seq_len, batch, input_size), jnp.float32)

    # One-time parameter prep (outside the per-call path).
    w_packed, b = prepare_lstm_params(w_ih, w_hh, b_ih, b_hh)
    w_packed = jax.block_until_ready(w_packed)
    b = jax.block_until_ready(b)

    fwd = jax.jit(neural_network_forward)
    out = jax.block_until_ready(fwd(x, w_packed, b))

    ref = neural_network_forward_ref(x, w_ih, w_hh, b_ih, b_hh)
    assert out.shape == (batch, hidden)
    assert out.dtype == jnp.float32
    # bf16 MXU operands (f32 accumulate) => slightly looser tolerance than f32.
    assert jnp.allclose(out, ref, atol=5e-2, rtol=5e-2), (
        f"max abs err = {jnp.max(jnp.abs(out - ref))}")

    print("KERNEL_OK")
</pallas_src>

<mosaic_0001>
module attributes {stable_mosaic.version = 11 : i64} {
  func.func @lstm_last_kernel(%arg0: memref<64x16xf32, #tpu.memory_space<vmem>>, %arg1: memref<48x128xbf16, #tpu.memory_space<vmem>>, %arg2: memref<1x128xf32, #tpu.memory_space<vmem>>, %arg3: memref<8x32xf32, #tpu.memory_space<vmem>>) attributes {dimension_semantics = [], scalar_prefetch = 0 : i64, scratch_operands = 0 : i64, tpu.core_type = #tpu.core_type<tc>} {
    %c0 = arith.constant 0 : index
    %c0_0 = arith.constant 0 : index
    %0 = vector.load %arg0[%c0, %c0_0] : memref<64x16xf32, #tpu.memory_space<vmem>>, vector<64x16xf32>
    %1 = arith.truncf %0 : vector<64x16xf32> to vector<64x16xbf16>
    %c0_1 = arith.constant 0 : index
    %c0_2 = arith.constant 0 : index
    %2 = vector.load %arg1[%c0_1, %c0_2] : memref<48x128xbf16, #tpu.memory_space<vmem>>, vector<48x128xbf16>
    %3 = vector.extract_strided_slice %2 {offsets = [0, 0], sizes = [16, 128], strides = [1, 1]} : vector<48x128xbf16> to vector<16x128xbf16>
    %4 = vector.extract_strided_slice %2 {offsets = [16, 0], sizes = [32, 128], strides = [1, 1]} : vector<48x128xbf16> to vector<32x128xbf16>
    %cst = arith.constant dense<0.000000e+00> : vector<64x128xf32>
    %5 = tpu.matmul %1, %3, %cst {dimension_numbers = #tpu.dot_dimension_numbers<[1], [0], [0], [1], [0, 0, 1, 1], [], []>} : vector<64x16xbf16>, vector<16x128xbf16>, vector<64x128xf32> -> vector<64x128xf32>
    %c0_3 = arith.constant 0 : index
    %c0_4 = arith.constant 0 : index
    %6 = vector.load %arg2[%c0_3, %c0_4] : memref<1x128xf32, #tpu.memory_space<vmem>>, vector<1x128xf32>
    %7 = vector.broadcast %6 : vector<1x128xf32> to vector<64x128xf32>
    %8 = arith.addf %5, %7 : vector<64x128xf32>
    %9 = tpu.iota {dimensions = array<i32: 1>} : vector<8x128xi32>
    %c64_i32 = arith.constant 64 : i32
    %10 = vector.broadcast %c64_i32 : i32 to vector<8x128xi32>
    %11 = arith.cmpi sge, %9, %10 : vector<8x128xi32>
    %c96_i32 = arith.constant 96 : i32
    %12 = vector.broadcast %c96_i32 : i32 to vector<8x128xi32>
    %13 = arith.cmpi slt, %9, %12 : vector<8x128xi32>
    %14 = arith.andi %11, %13 : vector<8x128xi1>
    %cst_5 = arith.constant 1.000000e+00 : f32
    %cst_6 = arith.constant 5.000000e-01 : f32
    %15 = vector.broadcast %cst_5 : f32 to vector<8x128xf32>
    %16 = vector.broadcast %cst_6 : f32 to vector<8x128xf32>
    %17 = arith.select %14, %15, %16 : vector<8x128xi1>, vector<8x128xf32>
    %cst_7 = arith.constant 0.000000e+00 : f32
    %cst_8 = arith.constant 5.000000e-01 : f32
    %18 = vector.broadcast %cst_7 : f32 to vector<8x128xf32>
    %19 = vector.broadcast %cst_8 : f32 to vector<8x128xf32>
    %20 = arith.select %14, %18, %19 : vector<8x128xi1>, vector<8x128xf32>
    %21 = vector.extract_strided_slice %8 {offsets = [0, 0], sizes = [8, 128], strides = [1, 1]} : vector<64x128xf32> to vector<8x128xf32>
    %22 = arith.mulf %21, %17 : vector<8x128xf32>
    %23 = math.tanh %22 : vector<8x128xf32>
    %24 = arith.mulf %23, %17 : vector<8x128xf32>
    %25 = arith.addf %24, %20 : vector<8x128xf32>
    %26 = vector.extract_strided_slice %25 {offsets = [0, 0], sizes = [8, 32], strides = [1, 1]} : vector<8x128xf32> to vector<8x32xf32>
    %27 = vector.extract_strided_slice %25 {offsets = [0, 64], sizes = [8, 32], strides = [1, 1]} : vector<8x128xf32> to vector<8x32xf32>
    %28 = vector.extract_strided_slice %25 {offsets = [0, 96], sizes = [8, 32], strides = [1, 1]} : vector<8x128xf32> to vector<8x32xf32>
    %29 = arith.mulf %26, %27 : vector<8x32xf32>
    %30 = math.tanh %29 : vector<8x32xf32>
    %31 = arith.mulf %28, %30 : vector<8x32xf32>
    %32 = vector.extract_strided_slice %8 {offsets = [8, 0], sizes = [8, 128], strides = [1, 1]} : vector<64x128xf32> to vector<8x128xf32>
    %33 = arith.truncf %31 : vector<8x32xf32> to vector<8x32xbf16>
    %cst_9 = arith.constant dense<0.000000e+00> : vector<8x128xf32>
    %34 = tpu.matmul %33, %4, %cst_9 {dimension_numbers = #tpu.dot_dimension_numbers<[1], [0], [0], [1], [0, 0, 1, 1], [], []>} : vector<8x32xbf16>, vector<32x128xbf16>, vector<8x128xf32> -> vector<8x128xf32>
    %35 = arith.addf %32, %34 : vector<8x128xf32>
    %36 = arith.mulf %35, %17 : vector<8x128xf32>
    %37 = math.tanh %36 : vector<8x128xf32>
    %38 = arith.mulf %37, %17 : vector<8x128xf32>
    %39 = arith.addf %38, %20 : vector<8x128xf32>
    %40 = vector.extract_strided_slice %39 {offsets = [0, 0], sizes = [8, 32], strides = [1, 1]} : vector<8x128xf32> to vector<8x32xf32>
    %41 = vector.extract_strided_slice %39 {offsets = [0, 32], sizes = [8, 32], strides = [1, 1]} : vector<8x128xf32> to vector<8x32xf32>
    %42 = vector.extract_strided_slice %39 {offsets = [0, 64], sizes = [8, 32], strides = [1, 1]} : vector<8x128xf32> to vector<8x32xf32>
    %43 = vector.extract_strided_slice %39 {offsets = [0, 96], sizes = [8, 32], strides = [1, 1]} : vector<8x128xf32> to vector<8x32xf32>
    %44 = arith.mulf %41, %29 : vector<8x32xf32>
    %45 = arith.mulf %40, %42 : vector<8x32xf32>
    %46 = arith.addf %44, %45 : vector<8x32xf32>
    %47 = math.tanh %46 : vector<8x32xf32>
    %48 = arith.mulf %43, %47 : vector<8x32xf32>
    %49 = vector.extract_strided_slice %8 {offsets = [16, 0], sizes = [8, 128], strides = [1, 1]} : vector<64x128xf32> to vector<8x128xf32>
    %50 = arith.truncf %48 : vector<8x32xf32> to vector<8x32xbf16>
    %cst_10 = arith.constant dense<0.000000e+00> : vector<8x128xf32>
    %51 = tpu.matmul %50, %4, %cst_10 {dimension_numbers = #tpu.dot_dimension_numbers<[1], [0], [0], [1], [0, 0, 1, 1], [], []>} : vector<8x32xbf16>, vector<32x128xbf16>, vector<8x128xf32> -> vector<8x128xf32>
    %52 = arith.addf %49, %51 : vector<8x128xf32>
    %53 = arith.mulf %52, %17 : vector<8x128xf32>
    %54 = math.tanh %53 : vector<8x128xf32>
    %55 = arith.mulf %54, %17 : vector<8x128xf32>
    %56 = arith.addf %55, %20 : vector<8x128xf32>
    %57 = vector.extract_strided_slice %56 {offsets = [0, 0], sizes = [8, 32], strides = [1, 1]} : vector<8x128xf32> to vector<8x32xf32>
    %58 = vector.extract_strided_slice %56 {offsets = [0, 32], sizes = [8, 32], strides = [1, 1]} : vector<8x128xf32> to vector<8x32xf32>
    %59 = vector.extract_strided_slice %56 {offsets = [0, 64], sizes = [8, 32], strides = [1, 1]} : vector<8x128xf32> to vector<8x32xf32>
    %60 = vector.extract_strided_slice %56 {offsets = [0, 96], sizes = [8, 32], strides = [1, 1]} : vector<8x128xf32> to vector<8x32xf32>
    %61 = arith.mulf %58, %46 : vector<8x32xf32>
    %62 = arith.mulf %57, %59 : vector<8x32xf32>
    %63 = arith.addf %61, %62 : vector<8x32xf32>
    %64 = math.tanh %63 : vector<8x32xf32>
    %65 = arith.mulf %60, %64 : vector<8x32xf32>
    %66 = vector.extract_strided_slice %8 {offsets = [24, 0], sizes = [8, 128], strides = [1, 1]} : vector<64x128xf32> to vector<8x128xf32>
    %67 = arith.truncf %65 : vector<8x32xf32> to vector<8x32xbf16>
    %cst_11 = arith.constant dense<0.000000e+00> : vector<8x128xf32>
    %68 = tpu.matmul %67, %4, %cst_11 {dimension_numbers = #tpu.dot_dimension_numbers<[1], [0], [0], [1], [0, 0, 1, 1], [], []>} : vector<8x32xbf16>, vector<32x128xbf16>, vector<8x128xf32> -> vector<8x128xf32>
    %69 = arith.addf %66, %68 : vector<8x128xf32>
    %70 = arith.mulf %69, %17 : vector<8x128xf32>
    %71 = math.tanh %70 : vector<8x128xf32>
    %72 = arith.mulf %71, %17 : vector<8x128xf32>
    %73 = arith.addf %72, %20 : vector<8x128xf32>
    %74 = vector.extract_strided_slice %73 {offsets = [0, 0], sizes = [8, 32], strides = [1, 1]} : vector<8x128xf32> to vector<8x32xf32>
    %75 = vector.extract_strided_slice %73 {offsets = [0, 32], sizes = [8, 32], strides = [1, 1]} : vector<8x128xf32> to vector<8x32xf32>
    %76 = vector.extract_strided_slice %73 {offsets = [0, 64], sizes = [8, 32], strides = [1, 1]} : vector<8x128xf32> to vector<8x32xf32>
    %77 = vector.extract_strided_slice %73 {offsets = [0, 96], sizes = [8, 32], strides = [1, 1]} : vector<8x128xf32> to vector<8x32xf32>
    %78 = arith.mulf %75, %63 : vector<8x32xf32>
    %79 = arith.mulf %74, %76 : vector<8x32xf32>
    %80 = arith.addf %78, %79 : vector<8x32xf32>
    %81 = math.tanh %80 : vector<8x32xf32>
    %82 = arith.mulf %77, %81 : vector<8x32xf32>
    %83 = vector.extract_strided_slice %8 {offsets = [32, 0], sizes = [8, 128], strides = [1, 1]} : vector<64x128xf32> to vector<8x128xf32>
    %84 = arith.truncf %82 : vector<8x32xf32> to vector<8x32xbf16>
    %cst_12 = arith.constant dense<0.000000e+00> : vector<8x128xf32>
    %85 = tpu.matmul %84, %4, %cst_12 {dimension_numbers = #tpu.dot_dimension_numbers<[1], [0], [0], [1], [0, 0, 1, 1], [], []>} : vector<8x32xbf16>, vector<32x128xbf16>, vector<8x128xf32> -> vector<8x128xf32>
    %86 = arith.addf %83, %85 : vector<8x128xf32>
    %87 = arith.mulf %86, %17 : vector<8x128xf32>
    %88 = math.tanh %87 : vector<8x128xf32>
    %89 = arith.mulf %88, %17 : vector<8x128xf32>
    %90 = arith.addf %89, %20 : vector<8x128xf32>
    %91 = vector.extract_strided_slice %90 {offsets = [0, 0], sizes = [8, 32], strides = [1, 1]} : vector<8x128xf32> to vector<8x32xf32>
    %92 = vector.extract_strided_slice %90 {offsets = [0, 32], sizes = [8, 32], strides = [1, 1]} : vector<8x128xf32> to vector<8x32xf32>
    %93 = vector.extract_strided_slice %90 {offsets = [0, 64], sizes = [8, 32], strides = [1, 1]} : vector<8x128xf32> to vector<8x32xf32>
    %94 = vector.extract_strided_slice %90 {offsets = [0, 96], sizes = [8, 32], strides = [1, 1]} : vector<8x128xf32> to vector<8x32xf32>
    %95 = arith.mulf %92, %80 : vector<8x32xf32>
    %96 = arith.mulf %91, %93 : vector<8x32xf32>
    %97 = arith.addf %95, %96 : vector<8x32xf32>
    %98 = math.tanh %97 : vector<8x32xf32>
    %99 = arith.mulf %94, %98 : vector<8x32xf32>
    %100 = vector.extract_strided_slice %8 {offsets = [40, 0], sizes = [8, 128], strides = [1, 1]} : vector<64x128xf32> to vector<8x128xf32>
    %101 = arith.truncf %99 : vector<8x32xf32> to vector<8x32xbf16>
    %cst_13 = arith.constant dense<0.000000e+00> : vector<8x128xf32>
    %102 = tpu.matmul %101, %4, %cst_13 {dimension_numbers = #tpu.dot_dimension_numbers<[1], [0], [0], [1], [0, 0, 1, 1], [], []>} : vector<8x32xbf16>, vector<32x128xbf16>, vector<8x128xf32> -> vector<8x128xf32>
    %103 = arith.addf %100, %102 : vector<8x128xf32>
    %104 = arith.mulf %103, %17 : vector<8x128xf32>
    %105 = math.tanh %104 : vector<8x128xf32>
    %106 = arith.mulf %105, %17 : vector<8x128xf32>
    %107 = arith.addf %106, %20 : vector<8x128xf32>
    %108 = vector.extract_strided_slice %107 {offsets = [0, 0], sizes = [8, 32], strides = [1, 1]} : vector<8x128xf32> to vector<8x32xf32>
    %109 = vector.extract_strided_slice %107 {offsets = [0, 32], sizes = [8, 32], strides = [1, 1]} : vector<8x128xf32> to vector<8x32xf32>
    %110 = vector.extract_strided_slice %107 {offsets = [0, 64], sizes = [8, 32], strides = [1, 1]} : vector<8x128xf32> to vector<8x32xf32>
    %111 = vector.extract_strided_slice %107 {offsets = [0, 96], sizes = [8, 32], strides = [1, 1]} : vector<8x128xf32> to vector<8x32xf32>
    %112 = arith.mulf %109, %97 : vector<8x32xf32>
    %113 = arith.mulf %108, %110 : vector<8x32xf32>
    %114 = arith.addf %112, %113 : vector<8x32xf32>
    %115 = math.tanh %114 : vector<8x32xf32>
    %116 = arith.mulf %111, %115 : vector<8x32xf32>
    %117 = vector.extract_strided_slice %8 {offsets = [48, 0], sizes = [8, 128], strides = [1, 1]} : vector<64x128xf32> to vector<8x128xf32>
    %118 = arith.truncf %116 : vector<8x32xf32> to vector<8x32xbf16>
    %cst_14 = arith.constant dense<0.000000e+00> : vector<8x128xf32>
    %119 = tpu.matmul %118, %4, %cst_14 {dimension_numbers = #tpu.dot_dimension_numbers<[1], [0], [0], [1], [0, 0, 1, 1], [], []>} : vector<8x32xbf16>, vector<32x128xbf16>, vector<8x128xf32> -> vector<8x128xf32>
    %120 = arith.addf %117, %119 : vector<8x128xf32>
    %121 = arith.mulf %120, %17 : vector<8x128xf32>
    %122 = math.tanh %121 : vector<8x128xf32>
    %123 = arith.mulf %122, %17 : vector<8x128xf32>
    %124 = arith.addf %123, %20 : vector<8x128xf32>
    %125 = vector.extract_strided_slice %124 {offsets = [0, 0], sizes = [8, 32], strides = [1, 1]} : vector<8x128xf32> to vector<8x32xf32>
    %126 = vector.extract_strided_slice %124 {offsets = [0, 32], sizes = [8, 32], strides = [1, 1]} : vector<8x128xf32> to vector<8x32xf32>
    %127 = vector.extract_strided_slice %124 {offsets = [0, 64], sizes = [8, 32], strides = [1, 1]} : vector<8x128xf32> to vector<8x32xf32>
    %128 = vector.extract_strided_slice %124 {offsets = [0, 96], sizes = [8, 32], strides = [1, 1]} : vector<8x128xf32> to vector<8x32xf32>
    %129 = arith.mulf %126, %114 : vector<8x32xf32>
    %130 = arith.mulf %125, %127 : vector<8x32xf32>
    %131 = arith.addf %129, %130 : vector<8x32xf32>
    %132 = math.tanh %131 : vector<8x32xf32>
    %133 = arith.mulf %128, %132 : vector<8x32xf32>
    %134 = vector.extract_strided_slice %8 {offsets = [56, 0], sizes = [8, 128], strides = [1, 1]} : vector<64x128xf32> to vector<8x128xf32>
    %135 = arith.truncf %133 : vector<8x32xf32> to vector<8x32xbf16>
    %cst_15 = arith.constant dense<0.000000e+00> : vector<8x128xf32>
    %136 = tpu.matmul %135, %4, %cst_15 {dimension_numbers = #tpu.dot_dimension_numbers<[1], [0], [0], [1], [0, 0, 1, 1], [], []>} : vector<8x32xbf16>, vector<32x128xbf16>, vector<8x128xf32> -> vector<8x128xf32>
    %137 = arith.addf %134, %136 : vector<8x128xf32>
    %138 = arith.mulf %137, %17 : vector<8x128xf32>
    %139 = math.tanh %138 : vector<8x128xf32>
    %140 = arith.mulf %139, %17 : vector<8x128xf32>
    %141 = arith.addf %140, %20 : vector<8x128xf32>
    %142 = vector.extract_strided_slice %141 {offsets = [0, 0], sizes = [8, 32], strides = [1, 1]} : vector<8x128xf32> to vector<8x32xf32>
    %143 = vector.extract_strided_slice %141 {offsets = [0, 32], sizes = [8, 32], strides = [1, 1]} : vector<8x128xf32> to vector<8x32xf32>
    %144 = vector.extract_strided_slice %141 {offsets = [0, 64], sizes = [8, 32], strides = [1, 1]} : vector<8x128xf32> to vector<8x32xf32>
    %145 = vector.extract_strided_slice %141 {offsets = [0, 96], sizes = [8, 32], strides = [1, 1]} : vector<8x128xf32> to vector<8x32xf32>
    %146 = arith.mulf %143, %131 : vector<8x32xf32>
    %147 = arith.mulf %142, %144 : vector<8x32xf32>
    %148 = arith.addf %146, %147 : vector<8x32xf32>
    %149 = math.tanh %148 : vector<8x32xf32>
    %150 = arith.mulf %145, %149 : vector<8x32xf32>
    %c0_16 = arith.constant 0 : index
    %c0_17 = arith.constant 0 : index
    %151 = vector.load %arg3[%c0_16, %c0_17] : memref<8x32xf32, #tpu.memory_space<vmem>>, vector<8x32xf32>
    tpu.vector_store %arg3[%c0_16, %c0_17], %150 {strides = array<i32>} : memref<8x32xf32, #tpu.memory_space<vmem>>, vector<8x32xf32>,
    return
  }
}

</mosaic_0001>

<bundles_post_ra>
// kernel: neural_network_forward.1
= control target key start
LH: loop header
LB: loop body
LE: loop exit
PB: predicated region body
PF: predicated region fallthrough
CT: control target
= control target key end

     0   :  { %vm43_vm0 = vcmask 130048   ;;  %v85_v6 = vlaneseq  ;;  %v491_v10 = vmov 0.5   ;;  %s492_s23 = smov 64   ;;  %s494_s24 = smov 96   ;;  %vm123_vm4 = vcmask 261120   ;;  %s659_s1 = inlined_call_operand.vmem [shape: bf16[48,128], index: 1, kind: input, shape index: {}]   ;;  %s660_s0 = inlined_call_operand.vmem [shape: f32[64,16], index: 0, kind: input, shape index: {}]   ;;  %s661_s2 = inlined_call_operand.vmem [shape: f32[1,128], index: 2, kind: input, shape index: {}]   ;;  %s662_s3 = inlined_call_operand.vmem [shape: f32[8,32], index: 3, kind: output, shape index: {}]  }
   0x1   :  { %v450_v0 = vld [vmem:[%s659_s1] sm:$0xff]  ;;  %v521_v1 = vld [vmem:[%s659_s1 + $0x10] sm:$0xff]  ;;  %v16_v3 = vld [vmem:[%s660_s0 + $0x8] sm:$0xff] }
   0x2   :  { %v15_v2 = vld [vmem:[%s660_s0] sm:$0xff]  ;;  %v532_v4 = vld [vmem:[%s659_s1 + $0x8] sm:$0xff]  ;;  %63 = vmatpush.bf16.msra.mxu0 %v450_v0  ;;  %133 = vmatpush.bf16.msra.mxu1 %v521_v1  ;;  %v86_v7 = vand.u32 127, %v85_v6  ;;  %v21_v41 = vld [vmem:[%s660_s0 + $0x30] sm:$0xff] }
   0x3   :  { %v23_v5 = vpack.c.bf16 %v16_v3, %v15_v2  ;;  %453 = vmatpush.bf16.msra.mxu2 %v450_v0  ;;  %221 = vmatpush.bf16.msra.mxu3 %v521_v1  ;;  %v548_v8 = vld [vmem:[%s661_s2] ss:$0 sm:$0xff]  ;;  %s493_s2 = smov 32   ;;  %v22_v42 = vld [vmem:[%s660_s0 + $0x38] sm:$0xff]  ;;  %v17_v43 = vld [vmem:[%s660_s0 + $0x10] sm:$0xff] }
   0x4   :  { %vm87_vm1 = vcmp.ge.s32.totalorder %v86_v7, 64  ;;  %vm88_vm2 = vcmp.lt.s32.totalorder %v86_v7, 96  ;;  %v26_v44 = vpack.c.bf16 %v22_v42, %v21_v41  ;;  %v18_v45 = vld [vmem:[%s660_s0 + $0x18] sm:$0xff] }
   0x5   :  { %431 = vmatmul.msk.bf16.vlgmr.msra.gmra.mxu0 %vm43_vm0, %v23_v5  ;;  %vm89_vm3 = vmand %vm87_vm1, %vm88_vm2  ;;  %v24_v46 = vpack.c.bf16 %v18_v45, %v17_v43 }
   0x6   :  { %134 = vmatpush.bf16.msra.mxu1 %v532_v4  ;;  %v550_v11 = vsel %vm89_vm3, 1.0, %v491_v10  ;;  %v554_v15 = vsel %vm89_vm3, 0.0, %v491_v10  ;;  %434 = vmatmul.msk.bf16.vlgmr.msra.gmra.mxu2 %vm43_vm0, %v26_v44 }
   0x7   :  { %179 = vmatpush.bf16.msrb.mxu2 %v521_v1  ;;  %222 = vmatpush.bf16.msra.mxu3 %v532_v4 }
   0xa   :  { %263 = vmatpush.bf16.msrb.mxu1 %v521_v1 }
   0xb   :  { %180 = vmatpush.bf16.msrb.mxu2 %v532_v4  ;;  %347 = vmatpush.bf16.msrb.mxu3 %v521_v1 }
   0xe   :  { %264 = vmatpush.bf16.msrb.mxu1 %v532_v4 }
   0xf   :  { %348 = vmatpush.bf16.msrb.mxu3 %v532_v4  ;;  %305 = vmatpush.bf16.msra.mxu2 %v521_v1 }
  0x13   :  { %306 = vmatpush.bf16.msra.mxu2 %v532_v4 }
  0x15   :  { %432 = vmatmul.msk.bf16.gmra.mxu0 %vm43_vm0, %v24_v46 }
  0x82   :  { %v65_v9 = vpop.f32.mrf.mxu0 }
  0x83   :  { %v66_v12 = vadd.f32 %v548_v8, %v65_v9 }
  0x85   :  { %v92_v13 = vmul.f32 %v550_v11, %v66_v12 }
  0x87   :  { %459 = vtanh.f32 %v92_v13 }
  0x89   :  { %v589_v51 = vpop.f32.mrf.mxu2 }
  0x8a   :  { %v67_v25 = vpop.f32.mrf.mxu0 }
  0x8b   :  { %v68_v26 = vadd.f32 %v548_v8, %v67_v25 }
  0x8d   :  { %v460_v14 = vpop.eup %459 }
  0x8e   :  { %v94_v16 = vmul.f32 %v460_v14, %v550_v11 }
  0x90   :  { %v95_v17 = vadd.f32 %v94_v16, %v554_v15 }
  0x91   :  { %v591_v52 = vpop.f32.mrf.mxu2 }
  0x92   :  { %97 = vrot.lane.b32.xlu0 %v95_v17, %s492_s23  ;;  %v70_v53 = vpop.f32.mrf.mxu0 }
  0x93   :  { %v71_v54 = vadd.f32 %v548_v8, %v70_v53 }
  0x9a   :  { %v72_v9 = vpop.f32.mrf.mxu0 }
  0x9b   :  { %v73_v10 = vadd.f32 %v548_v8, %v72_v9 }
 0x104   :  { %v98_v18 = vpop.permute.xlu0 %97 }
 0x105   :  { %v100_v19 = vmul.f32 %v98_v18, %v95_v17 }
 0x107   :  { %461 = vtanh.f32 %v100_v19  ;;  %146 = vrot.lane.b32.xlu2 %v100_v19, %s493_s2 }
 0x10d   :  { %v462_v20 = vpop.eup %461 }
 0x10e   :  { %103 = vrot.lane.b32.xlu0 %v462_v20, %s494_s24 }
 0x161   :  { %v147_v36 = vpop.permute.xlu2 %146 }
 0x180   :  { %v104_v21 = vpop.permute.xlu0 %103 }
 0x181   :  { %v106_v22 = vmul.f32 %v104_v21, %v95_v17 }
 0x183   :  { %v107_v23 = vpack.c.bf16 %v106_v22, %v106_v22 }
 0x185   :  { %109 = vrot.lane.b32.xlu1 %v107_v23, %s493_s2 }
 0x1f7   :  { %v110_v24 = vpop.permute.xlu1 %109 }
 0x1f8   :  { %443 = vmatmul.msk.bf16.vlgmr.msra.gmra.mxu1 %vm123_vm4, %v110_v24 }
 0x1f9   :  { %389 = vmatpush.bf16.msra.mxu1 %v521_v1 }
 0x1fd   :  { %390 = vmatpush.bf16.msra.mxu1 %v532_v4 }
 0x275   :  { %v136_v27 = vpop.f32.mrf.mxu1 }
 0x276   :  { %v140_v28 = vadd.f32 %v136_v27, %v68_v26  ;;  %v19_v26 = vld [vmem:[%s660_s0 + $0x20] sm:$0xff]  ;;  %v20_v27 = vld [vmem:[%s660_s0 + $0x28] sm:$0xff] }
 0x278   :  { %v141_v29 = vmul.f32 %v140_v28, %v550_v11  ;;  %v25_v28 = vpack.c.bf16 %v20_v27, %v19_v26 }
 0x27a   :  { %463 = vtanh.f32 %v141_v29  ;;  %433 = vmatmul.msk.bf16.gmra.mxu0 %vm43_vm0, %v25_v28 }
 0x27d   :  { %v138_v30 = vpop.f32.mrf.mxu1 }
 0x280   :  { %v464_v31 = vpop.eup %463 }
 0x281   :  { %v143_v32 = vmul.f32 %v464_v31, %v550_v11 }
 0x283   :  { %v144_v33 = vadd.f32 %v143_v32, %v554_v15 }
 0x285   :  { %151 = vrot.lane.b32.xlu1 %v144_v33, %s492_s23  ;;  %v149_v37 = vmul.f32 %v147_v36, %v144_v33 }
 0x2f7   :  { %v152_v34 = vpop.permute.xlu1 %151 }
 0x2f8   :  { %v154_v35 = vmul.f32 %v152_v34, %v144_v33 }
 0x2fa   :  { %156 = vrot.lane.b32.xlu2 %v154_v35, %s493_s2 }
 0x354   :  { %v157_v38 = vpop.permute.xlu2 %156 }
 0x355   :  { %v159_v39 = vadd.f32 %v157_v38, %v149_v37 }
 0x357   :  { %465 = vtanh.f32 %v159_v39 }
 0x35d   :  { %v466_v40 = vpop.eup %465 }
 0x35e   :  { %162 = vrot.lane.b32.xlu0 %v466_v40, %s492_s23 }
 0x3d0   :  { %v163_v47 = vpop.permute.xlu0 %162 }
 0x3d1   :  { %v165_v48 = vmul.f32 %v163_v47, %v144_v33  ;;  %v75_v33 = vpop.f32.mrf.mxu0 }
 0x3d2   :  { %v76_v34 = vadd.f32 %v548_v8, %v75_v33 }
 0x3d3   :  { %v166_v49 = vpack.c.bf16 %v165_v48, %v165_v48 }
 0x3d5   :  { %168 = vrot.lane.b32.xlu1 %v166_v49, %s493_s2 }
 0x447   :  { %v169_v50 = vpop.permute.xlu1 %168 }
 0x448   :  { %444 = vmatmul.msk.bf16.vlgmr.msrb.gmra.mxu2 %vm123_vm4, %v169_v50 }
 0x4cb   :  { %v182_v55 = vpop.f32.mrf.mxu2 }
 0x4cc   :  { %v186_v56 = vadd.f32 %v182_v55, %v71_v54  ;;  %v77_v54 = vpop.f32.mrf.mxu0 }
 0x4cd   :  { %v78_v55 = vadd.f32 %v548_v8, %v77_v54 }
 0x4ce   :  { %v187_v57 = vmul.f32 %v186_v56, %v550_v11 }
 0x4d0   :  { %467 = vtanh.f32 %v187_v57 }
 0x4d3   :  { %v184_v58 = vpop.f32.mrf.mxu2 }
 0x4d6   :  { %v468_v59 = vpop.eup %467 }
 0x4d7   :  { %v189_v60 = vmul.f32 %v468_v59, %v550_v11 }
 0x4d9   :  { %v190_v61 = vadd.f32 %v189_v60, %v554_v15 }
 0x4db   :  { %193 = vrot.lane.b32.xlu2 %v190_v61, %s492_s23  ;;  %v191_v0 = vmul.f32 %v190_v61, %v159_v39 }
 0x535   :  { %v194_v62 = vpop.permute.xlu2 %193 }
 0x536   :  { %v196_v63 = vmul.f32 %v194_v62, %v190_v61 }
 0x538   :  { %198 = vrot.lane.b32.xlu0 %v196_v63, %s493_s2 }
 0x5aa   :  { %v199_v1 = vpop.permute.xlu0 %198 }
 0x5ab   :  { %v201_v2 = vadd.f32 %v199_v1, %v191_v0 }
 0x5ad   :  { %469 = vtanh.f32 %v201_v2 }
 0x5b3   :  { %v470_v3 = vpop.eup %469 }
 0x5b4   :  { %204 = vrot.lane.b32.xlu1 %v470_v3, %s492_s23 }
 0x626   :  { %v205_v4 = vpop.permute.xlu1 %204 }
 0x627   :  { %v207_v5 = vmul.f32 %v205_v4, %v190_v61 }
 0x629   :  { %v208_v6 = vpack.c.bf16 %v207_v5, %v207_v5 }
 0x62b   :  { %210 = vrot.lane.b32.xlu2 %v208_v6, %s493_s2 }
 0x685   :  { %v211_v7 = vpop.permute.xlu2 %210 }
 0x686   :  { %445 = vmatmul.msk.bf16.vlgmr.msra.gmra.mxu3 %vm123_vm4, %v211_v7 }
 0x709   :  { %v224_v12 = vpop.f32.mrf.mxu3 }
 0x70a   :  { %v228_v13 = vadd.f32 %v224_v12, %v73_v10  ;;  %v81_v10 = vadd.f32 %v548_v8, %v589_v51 }
 0x70c   :  { %v229_v14 = vmul.f32 %v228_v13, %v550_v11 }
 0x70e   :  { %471 = vtanh.f32 %v229_v14 }
 0x711   :  { %v226_v16 = vpop.f32.mrf.mxu3 }
 0x714   :  { %v472_v17 = vpop.eup %471 }
 0x715   :  { %v231_v18 = vmul.f32 %v472_v17, %v550_v11 }
 0x717   :  { %v232_v19 = vadd.f32 %v231_v18, %v554_v15 }
 0x719   :  { %235 = vrot.lane.b32.xlu0 %v232_v19, %s492_s23  ;;  %v233_v22 = vmul.f32 %v232_v19, %v201_v2 }
 0x78b   :  { %v236_v20 = vpop.permute.xlu0 %235 }
 0x78c   :  { %v238_v21 = vmul.f32 %v236_v20, %v232_v19 }
 0x78e   :  { %240 = vrot.lane.b32.xlu1 %v238_v21, %s493_s2 }
 0x800   :  { %v241_v23 = vpop.permute.xlu1 %240 }
 0x801   :  { %v243_v24 = vadd.f32 %v241_v23, %v233_v22 }
 0x803   :  { %473 = vtanh.f32 %v243_v24 }
 0x809   :  { %v474_v25 = vpop.eup %473 }
 0x80a   :  { %246 = vrot.lane.b32.xlu2 %v474_v25, %s492_s23 }
 0x864   :  { %v247_v29 = vpop.permute.xlu2 %246 }
 0x865   :  { %v249_v30 = vmul.f32 %v247_v29, %v232_v19  ;;  %v83_v29 = vadd.f32 %v548_v8, %v591_v52 }
 0x867   :  { %v250_v31 = vpack.c.bf16 %v249_v30, %v249_v30 }
 0x869   :  { %252 = vrot.lane.b32.xlu0 %v250_v31, %s493_s2 }
 0x8db   :  { %v253_v32 = vpop.permute.xlu0 %252 }
 0x8dc   :  { %446 = vmatmul.msk.bf16.vlgmr.msrb.gmra.mxu1 %vm123_vm4, %v253_v32 }
 0x959   :  { %v266_v35 = vpop.f32.mrf.mxu1 }
 0x95a   :  { %v270_v36 = vadd.f32 %v266_v35, %v76_v34 }
 0x95c   :  { %v271_v37 = vmul.f32 %v270_v36, %v550_v11 }
 0x95e   :  { %475 = vtanh.f32 %v271_v37 }
 0x961   :  { %v268_v38 = vpop.f32.mrf.mxu1 }
 0x964   :  { %v476_v39 = vpop.eup %475 }
 0x965   :  { %v273_v40 = vmul.f32 %v476_v39, %v550_v11 }
 0x967   :  { %v274_v41 = vadd.f32 %v273_v40, %v554_v15 }
 0x969   :  { %277 = vrot.lane.b32.xlu1 %v274_v41, %s492_s23  ;;  %v275_v44 = vmul.f32 %v274_v41, %v243_v24 }
 0x9db   :  { %v278_v42 = vpop.permute.xlu1 %277 }
 0x9dc   :  { %v280_v43 = vmul.f32 %v278_v42, %v274_v41 }
 0x9de   :  { %282 = vrot.lane.b32.xlu2 %v280_v43, %s493_s2 }
 0xa38   :  { %v283_v45 = vpop.permute.xlu2 %282 }
 0xa39   :  { %v285_v46 = vadd.f32 %v283_v45, %v275_v44 }
 0xa3b   :  { %477 = vtanh.f32 %v285_v46 }
 0xa41   :  { %v478_v47 = vpop.eup %477 }
 0xa42   :  { %288 = vrot.lane.b32.xlu0 %v478_v47, %s492_s23 }
 0xab4   :  { %v289_v48 = vpop.permute.xlu0 %288 }
 0xab5   :  { %v291_v49 = vmul.f32 %v289_v48, %v274_v41 }
 0xab7   :  { %v292_v50 = vpack.c.bf16 %v291_v49, %v291_v49 }
 0xab9   :  { %294 = vrot.lane.b32.xlu1 %v292_v50, %s493_s2 }
 0xb2b   :  { %v295_v53 = vpop.permute.xlu1 %294 }
 0xb2c   :  { %447 = vmatmul.msk.bf16.vlgmr.msra.gmra.mxu2 %vm123_vm4, %v295_v53 }
 0xbaf   :  { %v308_v56 = vpop.f32.mrf.mxu2 }
 0xbb0   :  { %v312_v57 = vadd.f32 %v308_v56, %v78_v55 }
 0xbb2   :  { %v313_v58 = vmul.f32 %v312_v57, %v550_v11 }
 0xbb4   :  { %479 = vtanh.f32 %v313_v58 }
 0xbb7   :  { %v310_v59 = vpop.f32.mrf.mxu2 }
 0xbba   :  { %v480_v60 = vpop.eup %479 }
 0xbbb   :  { %v315_v61 = vmul.f32 %v480_v60, %v550_v11 }
 0xbbd   :  { %v316_v62 = vadd.f32 %v315_v61, %v554_v15 }
 0xbbf   :  { %319 = vrot.lane.b32.xlu2 %v316_v62, %s492_s23  ;;  %v317_v1 = vmul.f32 %v316_v62, %v285_v46 }
 0xc19   :  { %v320_v63 = vpop.permute.xlu2 %319 }
 0xc1a   :  { %v322_v0 = vmul.f32 %v320_v63, %v316_v62 }
 0xc1c   :  { %324 = vrot.lane.b32.xlu0 %v322_v0, %s493_s2 }
 0xc8e   :  { %v325_v2 = vpop.permute.xlu0 %324 }
 0xc8f   :  { %v327_v3 = vadd.f32 %v325_v2, %v317_v1 }
 0xc91   :  { %481 = vtanh.f32 %v327_v3 }
 0xc97   :  { %v482_v4 = vpop.eup %481 }
 0xc98   :  { %330 = vrot.lane.b32.xlu1 %v482_v4, %s492_s23 }
 0xd0a   :  { %v331_v5 = vpop.permute.xlu1 %330 }
 0xd0b   :  { %v333_v6 = vmul.f32 %v331_v5, %v316_v62 }
 0xd0d   :  { %v334_v7 = vpack.c.bf16 %v333_v6, %v333_v6 }
 0xd0f   :  { %336 = vrot.lane.b32.xlu2 %v334_v7, %s493_s2 }
 0xd69   :  { %v337_v9 = vpop.permute.xlu2 %336 }
 0xd6a   :  { %448 = vmatmul.msk.bf16.vlgmr.msrb.gmra.mxu3 %vm123_vm4, %v337_v9 }
 0xded   :  { %v350_v12 = vpop.f32.mrf.mxu3 }
 0xdee   :  { %v354_v13 = vadd.f32 %v350_v12, %v81_v10 }
 0xdf0   :  { %v355_v14 = vmul.f32 %v354_v13, %v550_v11 }
 0xdf2   :  { %483 = vtanh.f32 %v355_v14 }
 0xdf5   :  { %v352_v16 = vpop.f32.mrf.mxu3 }
 0xdf8   :  { %v484_v17 = vpop.eup %483 }
 0xdf9   :  { %v357_v18 = vmul.f32 %v484_v17, %v550_v11 }
 0xdfb   :  { %v358_v19 = vadd.f32 %v357_v18, %v554_v15 }
 0xdfd   :  { %361 = vrot.lane.b32.xlu0 %v358_v19, %s492_s23  ;;  %v359_v22 = vmul.f32 %v358_v19, %v327_v3 }
 0xe6f   :  { %v362_v20 = vpop.permute.xlu0 %361 }
 0xe70   :  { %v364_v21 = vmul.f32 %v362_v20, %v358_v19 }
 0xe72   :  { %366 = vrot.lane.b32.xlu1 %v364_v21, %s493_s2 }
 0xee4   :  { %v367_v23 = vpop.permute.xlu1 %366 }
 0xee5   :  { %v369_v51 = vadd.f32 %v367_v23, %v359_v22 }
 0xee7   :  { %485 = vtanh.f32 %v369_v51 }
 0xeed   :  { %v486_v24 = vpop.eup %485 }
 0xeee   :  { %372 = vrot.lane.b32.xlu2 %v486_v24, %s492_s23 }
 0xf48   :  { %v373_v25 = vpop.permute.xlu2 %372 }
 0xf49   :  { %v375_v26 = vmul.f32 %v373_v25, %v358_v19 }
 0xf4b   :  { %v376_v27 = vpack.c.bf16 %v375_v26, %v375_v26 }
 0xf4d   :  { %378 = vrot.lane.b32.xlu0 %v376_v27, %s493_s2 }
 0xfbf   :  { %v379_v28 = vpop.permute.xlu0 %378 }
 0xfc0   :  { %449 = vmatmul.msk.bf16.vlgmr.msra.gmra.mxu1 %vm123_vm4, %v379_v28 }
0x103d   :  { %v392_v30 = vpop.f32.mrf.mxu1 }
0x103e   :  { %v396_v31 = vadd.f32 %v392_v30, %v83_v29 }
0x1040   :  { %v397_v32 = vmul.f32 %v396_v31, %v550_v11 }
0x1042   :  { %487 = vtanh.f32 %v397_v32 }
0x1045   :  { %v394_v33 = vpop.f32.mrf.mxu1 }
0x1048   :  { %v488_v34 = vpop.eup %487 }
0x1049   :  { %v399_v35 = vmul.f32 %v488_v34, %v550_v11 }
0x104b   :  { %v400_v36 = vadd.f32 %v399_v35, %v554_v15 }
0x104d   :  { %403 = vrot.lane.b32.xlu1 %v400_v36, %s492_s23  ;;  %v401_v39 = vmul.f32 %v400_v36, %v369_v51 }
0x10bf   :  { %v404_v37 = vpop.permute.xlu1 %403 }
0x10c0   :  { %v406_v38 = vmul.f32 %v404_v37, %v400_v36 }
0x10c2   :  { %408 = vrot.lane.b32.xlu2 %v406_v38, %s493_s2 }
0x111c   :  { %v409_v40 = vpop.permute.xlu2 %408 }
0x111d   :  { %v411_v8 = vadd.f32 %v409_v40, %v401_v39 }
0x111f   :  { %489 = vtanh.f32 %v411_v8 }
0x1125   :  { %v490_v52 = vpop.eup %489 }
0x1126   :  { %414 = vrot.lane.b32.xlu0 %v490_v52, %s492_s23 }
0x1198   :  { %v415_v41 = vpop.permute.xlu0 %414 }
0x1199   :  { %v417_v42 = vmul.f32 %v415_v41, %v400_v36 }
0x119b   :  { %419 = vrot.lane.b32.xlu1 %v417_v42, %s493_s2 }
0x120d   :  { %v420_v11 = vpop.permute.xlu1 %419 }
0x120e   :  { %422 = vst.msk [vmem:[%s662_s3] sm:$0xff] %vm123_vm4, %v420_v11 }

</bundles_post_ra>
